<compile_context>
chip_gen: v6e
topology: v6e:2x2x1
jax: 0.10.0
libtpu: 0.0.40
codegen_flags: <defaults>
</compile_context>

<pallas_src>
import jax
import jax.numpy as jnp
from jax.experimental import pallas as pl
from jax.experimental.pallas import tpu as pltpu


def _outconv_kernel(x_ref, w_ref, b_ref, o_ref):
    # x_ref: (1, Cin, HWt)   w_ref: (Cout, Cin)   b_ref: (Cout, 1)   o_ref: (1, Cout, HWt)
    x = x_ref[0]                                                     # (Cin, HWt)
    y = jnp.dot(w_ref[...], x, preferred_element_type=jnp.float32)   # MXU, (Cout, HWt)
    o_ref[0] = (y + b_ref[...]).astype(o_ref.dtype)                  # lane-dense store


def _pick_hw_tile(hw):
    # Largest lane-dense tile (multiple of 128) that divides HW; fall back to full HW.
    for t in (2048, 1024, 512, 256, 128):
        if hw % t == 0:
            return t
    return hw


def out_conv(x_nchw, weight_oi11, bias):
    """1x1 Conv2d forward. x: (N, Cin, H, W); weight: (Cout, Cin, 1, 1); bias: (Cout,)."""
    n, cin, h, w = x_nchw.shape
    cout = weight_oi11.shape[0]
    hw = h * w
    hw_tile = _pick_hw_tile(hw)

    x2 = x_nchw.reshape(n, cin, hw).astype(jnp.float32)       # H*W on the lane axis
    w2 = weight_oi11.reshape(cout, cin).astype(jnp.float32)
    b2 = bias.reshape(cout, 1).astype(jnp.float32)

    out = pl.pallas_call(
        _outconv_kernel,
        out_shape=jax.ShapeDtypeStruct((n, cout, hw), jnp.float32),
        grid_spec=pltpu.PrefetchScalarGridSpec(
            num_scalar_prefetch=0,
            grid=(n, hw // hw_tile),
            in_specs=[
                pl.BlockSpec((1, cin, hw_tile), lambda i, j: (i, 0, j)),   # x tile
                pl.BlockSpec((cout, cin), lambda i, j: (0, 0)),            # weights (resident)
                pl.BlockSpec((cout, 1), lambda i, j: (0, 0)),              # bias
            ],
            out_specs=pl.BlockSpec((1, cout, hw_tile), lambda i, j: (i, 0, j)),
        ),
        compiler_params=pltpu.CompilerParams(
            dimension_semantics=("parallel", "parallel"),
        ),
    )(x2, w2, b2)

    return out.reshape(n, cout, h, w)


if __name__ == "__main__":
    key = jax.random.PRNGKey(0)
    kx, kw, kb = jax.random.split(key, 3)

    n, cin, h, w = 2, 4, 16, 16
    cout = 8

    x = jax.random.normal(kx, (n, cin, h, w), jnp.float32)
    weight = 0.1 * jax.random.normal(kw, (cout, cin, 1, 1), jnp.float32)
    bias = 0.05 * jax.random.normal(kb, (cout,), jnp.float32)

    y = jax.jit(out_conv)(x, weight, bias)
    jax.block_until_ready(y)

    # pure-JAX reference for the 1x1 conv (Conv2d kernel_size=1 with bias)
    ref = jnp.einsum("oi,nihw->nohw", weight.reshape(cout, cin), x) + bias[None, :, None, None]

    assert y.shape == (n, cout, h, w) and y.dtype == jnp.float32
    assert jnp.allclose(y, ref, atol=1e-5, rtol=1e-5), float(jnp.max(jnp.abs(y - ref)))
    print("KERNEL_OK")
</pallas_src>

<mosaic_0001>
module attributes {stable_mosaic.version = 11 : i64} {
  func.func @_outconv_kernel(%arg0: i32, %arg1: i32, %arg2: memref<1x4x256xf32, #tpu.memory_space<vmem>>, %arg3: memref<8x4xf32, #tpu.memory_space<vmem>>, %arg4: memref<8x1xf32, #tpu.memory_space<vmem>>, %arg5: memref<1x8x256xf32, #tpu.memory_space<vmem>>) attributes {dimension_semantics = [#tpu.dimension_semantics<parallel>, #tpu.dimension_semantics<parallel>], iteration_bounds = array<i64: 2, 1>, scalar_prefetch = 0 : i64, scratch_operands = 0 : i64, tpu.core_type = #tpu.core_type<tc>, window_params = [{transform_indices = @transform_0, window_bounds = array<i64: 1, 4, 256>}, {pipeline_mode = #tpu.pipeline_mode<synchronous>, transform_indices = @transform_1, window_bounds = array<i64: 8, 4>}, {pipeline_mode = #tpu.pipeline_mode<synchronous>, transform_indices = @transform_2, window_bounds = array<i64: 8, 1>}, {transform_indices = @transform_3, window_bounds = array<i64: 1, 8, 256>}]} {
    %c0 = arith.constant 0 : index
    %c0_0 = arith.constant 0 : index
    %c0_1 = arith.constant 0 : index
    %0 = vector.load %arg2[%c0, %c0_0, %c0_1] : memref<1x4x256xf32, #tpu.memory_space<vmem>>, vector<1x4x256xf32>
    %1 = vector.shape_cast %0 : vector<1x4x256xf32> to vector<4x256xf32>
    %c0_2 = arith.constant 0 : index
    %c0_3 = arith.constant 0 : index
    %2 = vector.load %arg3[%c0_2, %c0_3] : memref<8x4xf32, #tpu.memory_space<vmem>>, vector<8x4xf32>
    %cst = arith.constant dense<0.000000e+00> : vector<8x256xf32>
    %3 = tpu.matmul %2, %1, %cst {dimension_numbers = #tpu.dot_dimension_numbers<[1], [0], [0], [1], [0, 0, 1, 1], [], []>} : vector<8x4xf32>, vector<4x256xf32>, vector<8x256xf32> -> vector<8x256xf32>
    %c0_4 = arith.constant 0 : index
    %c0_5 = arith.constant 0 : index
    %4 = vector.load %arg4[%c0_4, %c0_5] : memref<8x1xf32, #tpu.memory_space<vmem>>, vector<8x1xf32>
    %5 = vector.broadcast %4 : vector<8x1xf32> to vector<8x256xf32>
    %6 = arith.addf %3, %5 : vector<8x256xf32>
    %c0_6 = arith.constant 0 : index
    %c0_7 = arith.constant 0 : index
    %c0_8 = arith.constant 0 : index
    %7 = vector.load %arg5[%c0_6, %c0_7, %c0_8] : memref<1x8x256xf32, #tpu.memory_space<vmem>>, vector<1x8x256xf32>
    %8 = vector.shape_cast %7 : vector<1x8x256xf32> to vector<8x256xf32>
    %9 = vector.shape_cast %6 : vector<8x256xf32> to vector<1x8x256xf32>
    tpu.vector_store %arg5[%c0_6, %c0_7, %c0_8], %9 {strides = array<i32>} : memref<1x8x256xf32, #tpu.memory_space<vmem>>, vector<1x8x256xf32>,
    return
  }
  func.func @transform_0(%arg0: i32, %arg1: i32) -> (i32, i32, i32) {
    %c0_i32 = arith.constant 0 : i32
    %c0_i32_0 = arith.constant 0 : i32
    return %arg0, %c0_i32, %arg1 : i32, i32, i32
  }
  func.func @transform_1(%arg0: i32, %arg1: i32) -> (i32, i32) {
    %c0_i32 = arith.constant 0 : i32
    %c0_i32_0 = arith.constant 0 : i32
    %c0_i32_1 = arith.constant 0 : i32
    return %c0_i32, %c0_i32_0 : i32, i32
  }
  func.func @transform_2(%arg0: i32, %arg1: i32) -> (i32, i32) {
    %c0_i32 = arith.constant 0 : i32
    %c0_i32_0 = arith.constant 0 : i32
    %c0_i32_1 = arith.constant 0 : i32
    return %c0_i32, %c0_i32_0 : i32, i32
  }
  func.func @transform_3(%arg0: i32, %arg1: i32) -> (i32, i32, i32) {
    %c0_i32 = arith.constant 0 : i32
    %c0_i32_0 = arith.constant 0 : i32
    return %arg0, %c0_i32, %arg1 : i32, i32, i32
  }
}

</mosaic_0001>

<bundles_post_ra>
// kernel: out_conv.1
= control target key start
LH: loop header
LB: loop body
LE: loop exit
PB: predicated region body
PF: predicated region fallthrough
CT: control target
= control target key end

     0   :  { %s479_s12 = smov 0   ;;  %s481_s13 = smov 0   ;;  %s518_s0 = inlined_call_operand.vmem [shape: f32[2,4,256], index: 0, kind: input, shape index: {}]   ;;  %s519_s1 = inlined_call_operand.vmem [shape: f32[8,4], index: 1, kind: input, shape index: {}]   ;;  %s520_s2 = inlined_call_operand.vmem [shape: f32[8,1], index: 2, kind: input, shape index: {}]   ;;  %s521_s3 = inlined_call_operand.vmem [shape: f32[2,8,256], index: 3, kind: output, shape index: {}]  }
   0x1   :  { %s483_s14 = smov 0  }
   0x2 LB: > { %s25_s15 = sadd.s32 1, %s451_s13  ;;  %p393_p0 = scmp.ge.s32.totalorder %s455_s14, 1  ;;  %s455_s14 = sphi %s483_s14, %s13_s14   ;;  %s451_s13 = sphi %s481_s13, %s523_s13   ;;  %s447_s12 = sphi %s479_s12, %s522_s12  }
   0x3   : > { %p27_p1 = scmp.ge.s32.totalorder %s25_s15, 2  ;;  %p158_p2 = scmp.lt.s32.totalorder %s455_s14, 3 }
   0x5   : > { %s525_s15 = smov (%p27_p1, %s25_s15), 0  ;;  %p159_p3 = pnand %p393_p0, %p158_p2 }
   0x6   : > { %p191_p4 = scmp.lt.s32.totalorder (!%p159_p3), %s447_s12, 1 }
   0x7   : > { %162 = sbr.rel (%p159_p3) target bundleno = 218 (0xda), region = 32 }
   0xc   : > { %v457_v0 = vmov 0.0   ;;  %v458_v1 = vmov 0   ;;  %v212_v2 = vld [vmem:[%s520_s2] sm:$0xff]  ;;  %s527_s12 = smov (!%p191_p4, %s447_s12), 1  ;;  %vm224_vm0 = vcmask 1043456   ;;  %vm220_vm1 = vcmask 31744  }
   0xd   : > { %293 = vmatprep.mubr.f32.mxu0 %v457_v0  ;;  %431 = vset.pattern.permute.xlu0 %v458_v1  ;;  %s403_s18 = sshll.u32 %s527_s12, 3  ;;  %v211_v5 = vld [vmem:[%s519_s1] sm:$0xff]  ;;  %s404_s24 = sshll.u32 %s527_s12, 4 }
   0xe   : > { %215 = vperm.xlu0 %431, %v212_v2   ;;  %s198_s21 = scalar_lea.vmem %s518_s0, %s403_s18  ;;  %s208_s27 = scalar_lea.vmem %s521_s3, %s404_s24 }
   0xf   : > { %v210_v3 = vld [vmem:[%s198_s21] sm:$0xff] }
  0x10   : > { %v219_v4 = vcombine.high %v210_v3, %v210_v3 }
  0x12   : > { %398 = vmatprep.subr.msk.mxu0 %vm224_vm0, %v219_v4 }
  0x13   : > { %399 = vmatpush1.msk.msra.mxu0 %vm224_vm0, %v210_v3 }
  0x14   : > { %400 = vmatmul.mubr.msk.f32.vlgmr.msra.gmra.mxu0 %vm220_vm1, %v211_v5 }
  0x89   : > { %v216_v6 = vpop.permute.xlu0 %215 }
  0xd4   : > { %v295_v7 = vpop.f32.mrf.mxu0 }
  0xd5   : > { %v296_v8 = vadd.f32 %v295_v7, %v216_v6 }
  0xd6   : > { %v297_v9 = vpop.f32.mrf.mxu0 }
  0xd7   : > { %300 = vst [vmem:[%s208_s27] sm:$0xff] %v296_v8  ;;  %v298_v10 = vadd.f32 %v297_v9, %v216_v6 }
  0xd9   : > { %301 = vst [vmem:[%s208_s27 + $0x8] sm:$0xff] %v298_v10 }
  0xda PF: > { %s13_s14 = sadd.s32 1, %s455_s14   ;;  %s522_s12 = smov %s451_s13 }
  0xdb   : > { %p10_p5 = scmp.ge.s32.totalorder %s13_s14, 4   ;;  %s523_s13 = smov %s525_s15 }
  0xdd   :  { %12 = sbr.rel (!%p10_p5) target bundleno = 2 (0x2), region = 62 }

</bundles_post_ra>
